<compile_context>
chip_gen: v7x
topology: tpu7x:2x2x1
jax: 0.10.0
libtpu: 0.0.40
codegen_flags: <defaults>
</compile_context>

<pallas_src>
import functools

import jax
import jax.numpy as jnp
from jax import lax
from jax.experimental import pallas as pl
from jax.experimental.pallas import tpu as pltpu

BN_EPS = 1e-5


def _shift_taps(x, kk, pad):
    """x: (C, L) tile -> (kk*C, L) im2col rows.

    Row k*C + c at column l holds x[c, l + k - pad] (zero outside [0, L)), so a PyTorch
    Conv1d weight (Cout, Cin, K) reshaped tap-major to (Cout, K*Cin) contracts against it
    directly in a single matmul.
    """
    c, l = x.shape
    taps = []
    for k in range(kk):
        s = k - pad
        if s == 0:
            taps.append(x)
        elif s > 0:
            taps.append(jnp.concatenate(
                [x[:, s:], jnp.zeros((c, s), x.dtype)], axis=1))
        else:
            taps.append(jnp.concatenate(
                [jnp.zeros((c, -s), x.dtype), x[:, :l + s]], axis=1))
    return jnp.concatenate(taps, axis=0)


def _conv_stats_kernel(x_ref, w_ref, h_ref, stats_ref, *, kk, pad):
    """conv1 (single im2col matmul) + fused per-channel sum / sum-sq accumulation."""
    n = pl.program_id(0)
    x = x_ref[0]                                        # (Cin, L)
    cols = _shift_taps(x, kk, pad)                      # (K*Cin, L)
    h = jnp.dot(w_ref[...], cols, preferred_element_type=jnp.float32)   # (Cmid, L)
    h_ref[0] = h

    @pl.when(n == 0)
    def _():
        stats_ref[...] = jnp.zeros_like(stats_ref)

    stats_ref[...] += jnp.concatenate(
        [jnp.sum(h, axis=-1, keepdims=True),
         jnp.sum(h * h, axis=-1, keepdims=True)], axis=-1)


def _bn_relu_conv_stats_kernel(h_ref, s_ref, g_ref, b_ref, w_ref,
                               y_ref, stats_ref, *, kk, pad, inv_count):
    """BN1 (from accumulated stats) + ReLU + conv2 + fused stats for BN2."""
    n = pl.program_id(0)
    mean = s_ref[:, 0:1] * inv_count                              # (Cmid, 1)
    var = jnp.maximum(s_ref[:, 1:2] * inv_count - mean * mean, 0.0)
    scale = g_ref[...] * lax.rsqrt(var + BN_EPS)                  # (Cmid, 1)
    shift = b_ref[...] - mean * scale
    a = jnp.maximum(h_ref[0] * scale + shift, 0.0)                # (Cmid, L)

    cols = _shift_taps(a, kk, pad)                                # (K*Cmid, L)
    y = jnp.dot(w_ref[...], cols, preferred_element_type=jnp.float32)   # (Cout, L)
    y_ref[0] = y

    @pl.when(n == 0)
    def _():
        stats_ref[...] = jnp.zeros_like(stats_ref)

    stats_ref[...] += jnp.concatenate(
        [jnp.sum(y, axis=-1, keepdims=True),
         jnp.sum(y * y, axis=-1, keepdims=True)], axis=-1)


def _bn_relu_kernel(y_ref, s_ref, g_ref, b_ref, o_ref, *, inv_count):
    """BN2 (from accumulated stats) + ReLU, written directly in NCL layout."""
    mean = s_ref[:, 0:1] * inv_count
    var = jnp.maximum(s_ref[:, 1:2] * inv_count - mean * mean, 0.0)
    scale = g_ref[...] * lax.rsqrt(var + BN_EPS)
    shift = b_ref[...] - mean * scale
    o_ref[0] = jnp.maximum(y_ref[0] * scale + shift, 0.0).astype(o_ref.dtype)


def double_conv1d(x_ncl, w1_oik, w2_oik, g1, b1, g2, b2, padding=1):
    """x_ncl: (N, Cin, L); conv weights in PyTorch layout (out, in, k); bias=False.

    BatchNorm is training-mode (batch statistics over N and L), matching a freshly
    constructed PyTorch module run in train().
    """
    N, Cin, L = x_ncl.shape
    Cmid, _, K = w1_oik.shape
    Cout, _, K2 = w2_oik.shape
    assert K2 == K
    assert L + 2 * padding - K + 1 == L, "fused kernel assumes 'same' padding"

    f32 = jnp.float32
    x = x_ncl.astype(f32)
    # Tap-major im2col weight matrices: element [co, k*Cin + ci] <- w[co, ci, k].
    w1m = jnp.transpose(w1_oik, (0, 2, 1)).reshape(Cmid, K * Cin).astype(f32)
    w2m = jnp.transpose(w2_oik, (0, 2, 1)).reshape(Cout, K * Cmid).astype(f32)
    g1c = g1.reshape(Cmid, 1).astype(f32)
    b1c = b1.reshape(Cmid, 1).astype(f32)
    g2c = g2.reshape(Cout, 1).astype(f32)
    b2c = b2.reshape(Cout, 1).astype(f32)

    inv_count = 1.0 / float(N * L)   # BatchNorm1d reduces over (N, L)

    def tile3d(c):   # per-batch (1, C, L) tile, channels on sublanes, L on lanes
        return pl.BlockSpec((1, c, L), lambda n: (n, 0, 0))

    def full2d(shape):   # small resident operand (weights / stats / affine params)
        return pl.BlockSpec(shape, lambda n: (0, 0))

    # ---- pass 1: conv1 + stats(h) ------------------------------------------------
    h, stats1 = pl.pallas_call(
        functools.partial(_conv_stats_kernel, kk=K, pad=padding),
        grid=(N,),
        in_specs=[tile3d(Cin), full2d((Cmid, K * Cin))],
        out_specs=(tile3d(Cmid), full2d((Cmid, 2))),
        out_shape=(jax.ShapeDtypeStruct((N, Cmid, L), f32),
                   jax.ShapeDtypeStruct((Cmid, 2), f32)),
        compiler_params=pltpu.CompilerParams(dimension_semantics=("arbitrary",)),
    )(x, w1m)

    # ---- pass 2: bn1 + relu + conv2 + stats(y) ------------------------------------
    y, stats2 = pl.pallas_call(
        functools.partial(_bn_relu_conv_stats_kernel, kk=K, pad=padding,
                          inv_count=inv_count),
        grid=(N,),
        in_specs=[tile3d(Cmid), full2d((Cmid, 2)), full2d((Cmid, 1)),
                  full2d((Cmid, 1)), full2d((Cout, K * Cmid))],
        out_specs=(tile3d(Cout), full2d((Cout, 2))),
        out_shape=(jax.ShapeDtypeStruct((N, Cout, L), f32),
                   jax.ShapeDtypeStruct((Cout, 2), f32)),
        compiler_params=pltpu.CompilerParams(dimension_semantics=("arbitrary",)),
    )(h, stats1, g1c, b1c, w2m)

    # ---- pass 3: bn2 + relu -> NCL output (batch axis fully parallel) -------------
    out = pl.pallas_call(
        functools.partial(_bn_relu_kernel, inv_count=inv_count),
        grid=(N,),
        in_specs=[tile3d(Cout), full2d((Cout, 2)), full2d((Cout, 1)),
                  full2d((Cout, 1))],
        out_specs=tile3d(Cout),
        out_shape=jax.ShapeDtypeStruct((N, Cout, L), x_ncl.dtype),
        compiler_params=pltpu.CompilerParams(dimension_semantics=("parallel",)),
    )(y, stats2, g2c, b2c)

    return out


def _reference(x, w1, w2, g1, b1, g2, b2, padding):
    """Pure-JAX reference matching PyTorch DoubleConv1d in train() mode."""
    def conv(inp, w):
        return lax.conv_general_dilated(
            inp, w, window_strides=(1,), padding=[(padding, padding)],
            dimension_numbers=("NCH", "OIH", "NCH"),
            precision=lax.Precision.HIGHEST)

    def bn_relu(z, g, b):
        mean = jnp.mean(z, axis=(0, 2), keepdims=True)
        var = jnp.mean((z - mean) ** 2, axis=(0, 2), keepdims=True)
        zn = (z - mean) * lax.rsqrt(var + BN_EPS)
        return jnp.maximum(zn * g.reshape(1, -1, 1) + b.reshape(1, -1, 1), 0.0)

    h = bn_relu(conv(x, w1), g1, b1)
    return bn_relu(conv(h, w2), g2, b2)


if __name__ == "__main__":
    # small shapes consistent with the module: batch=2, in_ch=4, mid=out=8, length=16
    N, Cin, Cmid, Cout, L, K = 2, 4, 8, 8, 16, 3

    key = jax.random.PRNGKey(0)
    kx, kw1, kw2 = jax.random.split(key, 3)
    x = jax.random.normal(kx, (N, Cin, L), dtype=jnp.float32)
    # deterministic synthetic params (PyTorch Conv1d weight layout: (out, in, k))
    w1 = jax.random.normal(kw1, (Cmid, Cin, K), dtype=jnp.float32) * 0.1
    w2 = jax.random.normal(kw2, (Cout, Cmid, K), dtype=jnp.float32) * 0.1
    # BatchNorm affine params at PyTorch default init
    g1, b1 = jnp.ones((Cmid,), jnp.float32), jnp.zeros((Cmid,), jnp.float32)
    g2, b2 = jnp.ones((Cout,), jnp.float32), jnp.zeros((Cout,), jnp.float32)

    out = double_conv1d(x, w1, w2, g1, b1, g2, b2, padding=1)
    out = jax.block_until_ready(out)
    assert out.shape == (N, Cout, L)

    ref = _reference(x, w1, w2, g1, b1, g2, b2, 1)
    err = float(jnp.max(jnp.abs(out - ref)))
    assert err < 2e-2, f"max abs err vs reference: {err}"
    print("KERNEL_OK")
</pallas_src>

<mosaic_0001>
module attributes {stable_mosaic.version = 11 : i64} {
  func.func @_conv_stats_kernel(%arg0: i32, %arg1: memref<1x4x16xf32, #tpu.memory_space<vmem>>, %arg2: memref<8x12xf32, #tpu.memory_space<vmem>>, %arg3: memref<1x8x16xf32, #tpu.memory_space<vmem>>, %arg4: memref<8x2xf32, #tpu.memory_space<vmem>>) attributes {dimension_semantics = [#tpu.dimension_semantics<arbitrary>], iteration_bounds = array<i64: 2>, scalar_prefetch = 0 : i64, scratch_operands = 0 : i64, tpu.core_type = #tpu.core_type<tc>, window_params = [{transform_indices = @transform_0, window_bounds = array<i64: 1, 4, 16>}, {pipeline_mode = #tpu.pipeline_mode<synchronous>, transform_indices = @transform_1, window_bounds = array<i64: 8, 12>}, {transform_indices = @transform_2, window_bounds = array<i64: 1, 8, 16>}, {pipeline_mode = #tpu.pipeline_mode<synchronous>, transform_indices = @transform_3, window_bounds = array<i64: 8, 2>}]} {
    %c0 = arith.constant 0 : index
    %c0_0 = arith.constant 0 : index
    %c0_1 = arith.constant 0 : index
    %0 = vector.load %arg1[%c0, %c0_0, %c0_1] : memref<1x4x16xf32, #tpu.memory_space<vmem>>, vector<1x4x16xf32>
    %1 = vector.shape_cast %0 : vector<1x4x16xf32> to vector<4x16xf32>
    %cst = arith.constant 0.000000e+00 : f32
    %2 = vector.broadcast %cst : f32 to vector<4x1xf32>
    %3 = vector.extract_strided_slice %1 {offsets = [0, 0], sizes = [4, 15], strides = [1, 1]} : vector<4x16xf32> to vector<4x15xf32>
    %4 = tpu.concatenate %2, %3 in 1 : vector<4x1xf32>, vector<4x15xf32> -> vector<4x16xf32>
    %5 = vector.extract_strided_slice %1 {offsets = [0, 1], sizes = [4, 15], strides = [1, 1]} : vector<4x16xf32> to vector<4x15xf32>
    %cst_2 = arith.constant 0.000000e+00 : f32
    %6 = vector.broadcast %cst_2 : f32 to vector<4x1xf32>
    %7 = tpu.concatenate %5, %6 in 1 : vector<4x15xf32>, vector<4x1xf32> -> vector<4x16xf32>
    %8 = tpu.concatenate %4, %1, %7 in 0 : vector<4x16xf32>, vector<4x16xf32>, vector<4x16xf32> -> vector<12x16xf32>
    %c0_3 = arith.constant 0 : index
    %c0_4 = arith.constant 0 : index
    %9 = vector.load %arg2[%c0_3, %c0_4] : memref<8x12xf32, #tpu.memory_space<vmem>>, vector<8x12xf32>
    %cst_5 = arith.constant dense<0.000000e+00> : vector<8x16xf32>
    %10 = tpu.matmul %9, %8, %cst_5 {dimension_numbers = #tpu.dot_dimension_numbers<[1], [0], [0], [1], [0, 0, 1, 1], [], []>} : vector<8x12xf32>, vector<12x16xf32>, vector<8x16xf32> -> vector<8x16xf32>
    %c0_6 = arith.constant 0 : index
    %c0_7 = arith.constant 0 : index
    %c0_8 = arith.constant 0 : index
    %11 = vector.load %arg3[%c0_6, %c0_7, %c0_8] : memref<1x8x16xf32, #tpu.memory_space<vmem>>, vector<1x8x16xf32>
    %12 = vector.shape_cast %11 : vector<1x8x16xf32> to vector<8x16xf32>
    %13 = vector.shape_cast %10 : vector<8x16xf32> to vector<1x8x16xf32>
    tpu.vector_store %arg3[%c0_6, %c0_7, %c0_8], %13 {strides = array<i32>} : memref<1x8x16xf32, #tpu.memory_space<vmem>>, vector<1x8x16xf32>,
    %c0_i32 = arith.constant 0 : i32
    %14 = arith.cmpi eq, %arg0, %c0_i32 : i32
    %15 = arith.extui %14 : i1 to i32
    %c0_i32_9 = arith.constant 0 : i32
    %16 = arith.cmpi ne, %15, %c0_i32_9 : i32
    scf.if %16 {
      %cst_16 = arith.constant 0.000000e+00 : f32
      %26 = vector.broadcast %cst_16 : f32 to vector<8x2xf32>
      %c0_17 = arith.constant 0 : index
      %c0_18 = arith.constant 0 : index
      %27 = vector.load %arg4[%c0_17, %c0_18] : memref<8x2xf32, #tpu.memory_space<vmem>>, vector<8x2xf32>
      tpu.vector_store %arg4[%c0_17, %c0_18], %26 {strides = array<i32>} : memref<8x2xf32, #tpu.memory_space<vmem>>, vector<8x2xf32>,
    } else {
    }
    %c0_10 = arith.constant 0 : index
    %c0_11 = arith.constant 0 : index
    %17 = vector.load %arg4[%c0_10, %c0_11] : memref<8x2xf32, #tpu.memory_space<vmem>>, vector<8x2xf32>
    %cst_12 = arith.constant dense<0.000000e+00> : vector<8xf32>
    %18 = vector.multi_reduction <add>, %10, %cst_12 [1] : vector<8x16xf32> to vector<8xf32>
    %19 = vector.shape_cast %18 : vector<8xf32> to vector<8x1xf32>
    %20 = arith.mulf %10, %10 : vector<8x16xf32>
    %cst_13 = arith.constant dense<0.000000e+00> : vector<8xf32>
    %21 = vector.multi_reduction <add>, %20, %cst_13 [1] : vector<8x16xf32> to vector<8xf32>
    %22 = vector.shape_cast %21 : vector<8xf32> to vector<8x1xf32>
    %23 = tpu.concatenate %19, %22 in 1 : vector<8x1xf32>, vector<8x1xf32> -> vector<8x2xf32>
    %24 = arith.addf %17, %23 : vector<8x2xf32>
    %c0_14 = arith.constant 0 : index
    %c0_15 = arith.constant 0 : index
    %25 = vector.load %arg4[%c0_14, %c0_15] : memref<8x2xf32, #tpu.memory_space<vmem>>, vector<8x2xf32>
    tpu.vector_store %arg4[%c0_14, %c0_15], %24 {strides = array<i32>} : memref<8x2xf32, #tpu.memory_space<vmem>>, vector<8x2xf32>,
    return
  }
  func.func @transform_0(%arg0: i32) -> (i32, i32, i32) {
    %c0_i32 = arith.constant 0 : i32
    %c0_i32_0 = arith.constant 0 : i32
    %c0_i32_1 = arith.constant 0 : i32
    return %arg0, %c0_i32, %c0_i32_0 : i32, i32, i32
  }
  func.func @transform_1(%arg0: i32) -> (i32, i32) {
    %c0_i32 = arith.constant 0 : i32
    %c0_i32_0 = arith.constant 0 : i32
    %c0_i32_1 = arith.constant 0 : i32
    return %c0_i32, %c0_i32_0 : i32, i32
  }
  func.func @transform_2(%arg0: i32) -> (i32, i32, i32) {
    %c0_i32 = arith.constant 0 : i32
    %c0_i32_0 = arith.constant 0 : i32
    %c0_i32_1 = arith.constant 0 : i32
    return %arg0, %c0_i32, %c0_i32_0 : i32, i32, i32
  }
  func.func @transform_3(%arg0: i32) -> (i32, i32) {
    %c0_i32 = arith.constant 0 : i32
    %c0_i32_0 = arith.constant 0 : i32
    %c0_i32_1 = arith.constant 0 : i32
    return %c0_i32, %c0_i32_0 : i32, i32
  }
}

</mosaic_0001>

<bundles_post_ra>
// kernel: tpu_custom_call.1
= control target key start
LH: loop header
LB: loop body
LE: loop exit
PB: predicated region body
PF: predicated region fallthrough
CT: control target
= control target key end

     0   :  { %9 = vsyncpa [#allocation3], 0  ;;  %s876_s0 = inlined_call_operand.hbm [shape: f32[2,4,16], index: 0, kind: input, shape index: {}]   ;;  %s877_s1 = inlined_call_operand.hbm [shape: f32[8,12], index: 1, kind: input, shape index: {}]   ;;  %s878_s2 = inlined_call_operand.hbm [shape: f32[2,8,16], index: 2, kind: output, shape index: {0}]   ;;  %s879_s3 = inlined_call_operand.vmem [shape: f32[8,2], index: 3, kind: output, shape index: {1}]  }
   0x1   :  { %11 = vsyncpa [#allocation3 + $0x1], 0 }
   0x2   :  { %12 = vsyncpa [#allocation6], 0 }
   0x3   :  { %13 = vsyncpa [#allocation4], 0 }
   0x4   :  { %15 = vsyncpa [#allocation4 + $0x1], 0  ;;  %s666_s12 = smov 0   ;;  %s668_s13 = smov 0  }
   0x5   :  { %s670_s14 = smov 0   ;;  %s672_s15 = smov 0  }
   0x6 LB: > { %s687_s16 = sadd.s32 4294967295, %s634_s15   ;;  %s411_s17 = sadd.s32 4294967294, %s634_s15   ;;  %s634_s15 = sphi %s672_s15, %s904_s15   ;;  %s630_s14 = sphi %s670_s14, %s903_s14   ;;  %s626_s13 = sphi %s668_s13, %s902_s13   ;;  %s622_s12 = sphi %s666_s12, %s901_s12  }
   0x7   : > { %p41_p0 = scmp.ne.s32.totalorder %s626_s13, %s622_s12  ;;  %p880_p1 = scmp.eq.s32.totalorder %s687_s16, 0 }
   0x8   : > { %p92_p3 = scmp.eq.s32.totalorder %s411_s17, 1  ;;  %p412_p5 = scmp.ge.s32.totalorder %s634_s15, 1 }
   0x9   : > { %p696_p4 = por %p880_p1, %p41_p0  ;;  %p120_p7 = scmp.lt.s32.totalorder %s634_s15, 3 }
   0xa   : > { %p701_p6 = por %p92_p3, %p41_p0  ;;  %s636_s21 = smov [#allocation5]  }
   0xb   : > { %s883_s18 = scalar_select %p696_p4, 1, 0 }
   0xc   : > { %s884_s19 = scalar_select %p701_p6, 1, 0 }
   0xd   : > { %p707_p9 = pnand %p412_p5, %p120_p7  ;;  %s133_s22 = sshll.u32 %s636_s21, 4  ;;  %s134_s22 = int_to_ptr.vmem [resolvable:$true] %s133_s22 }
   0xe   : > { %s715_s23 = sadd.s32 1, %s634_s15   ;;  %s28_s27 = sadd.s32 1, %s630_s14 }
   0xf   : > { %s885_s20 = scalar_select %p707_p9, 1, 0 }
  0x10   : > { %p450_p11 = pneg %p707_p9  ;;  %s25_s25 = ssub.s32 %s634_s15, %s715_s23 }
  0x11   : > { %p725_p13 = scmp.eq.s32.totalorder %s25_s25, 0  ;;  %s506_s30 = scalar_lea.hbm %s877_s1, 128 }
  0x12   : > { %p719_p12 = pnand %p450_p11, %p880_p1  ;;  %p507_p3 = scmp.ne.s32.totalorder %s877_s1, %s506_s30 }
  0x13   : > { %s887_s26 = scalar_select %p725_p13, 1, 0 }
  0x14   : > { %p508_p5 = pneg %p719_p12  ;;  %p513_p10 = scmp.lt.u32.totalorder %s506_s30, %s877_s1 }
  0x16   : > { %p509_p7 = pnand %p508_p5, %p507_p3 }
  0x18   : > { %p510_p11 = pneg %p509_p7 }
  0x1a   : > { %p515_p8 = pnand %p513_p10, %p510_p11 }
  0x1c   : > { %518 = shalt.err (!%p515_p8)
}
  0x1d   : > { %s519_s8 = scalar_lea.vmem %s134_s22, 128  ;;  %p527_p6 = scmp.lt.s32.totalorder %s134_s22, %s134_s22 }
  0x1e   : > { %p520_p1 = scmp.ne.s32.totalorder %s134_s22, %s519_s8  ;;  %p528_p4 = scmp.lt.s32.totalorder %s519_s8, %s519_s8 }
  0x20   : > { %p522_p2 = pnand %p520_p1, %p508_p5  ;;  %p529_p9 = por %p528_p4, %p527_p6 }
  0x22   : > { %p523_p0 = pneg %p522_p2 }
  0x24   : > { %p530_p13 = pnand %p529_p9, %p523_p0 }
  0x26   : > { %533 = shalt.err (!%p530_p13)
}
  0x27   : > { %453 = dma.hbm_to_vmem [thread:$0]  (!%p719_p12), %s877_s1, 128, %s134_s22, [#allocation6]  }
  0x28   : > { %p888_p1 = scmp.ne.s32.totalorder %s887_s26, 0  ;;  %p36_p2 = scmp.eq.s32.totalorder %s634_s15, 0 }
  0x29   : > { %p889_p4 = scmp.ne.s32.totalorder %s630_s14, %s626_s13  ;;  %p890_p6 = scmp.eq.s32.totalorder %s687_s16, 1 }
  0x2a   : > { %s751_s11 = scalar_select %p888_p1, %s630_s14, %s28_s27  }
  0x2b   : > { %p759_p8 = por %p890_p6, %p889_p4  ;;  %p463_p9 = scmp.lt.s32.totalorder %s634_s15, 2 }
  0x2c   : > { %s144_s21 = sand.u32 1, %s630_s14   ;;  %p892_p10 = pmov %p889_p4 }
  0x2d   : > { %s415_s24 = sshll.u32 %s144_s21, 2  ;;  %s416_s25 = sshll.u32 %s634_s15, 6 }
  0x2e   : > { %p37_p13 = por %p36_p2, %p892_p10  ;;  %s772_s22 = scalar_lea.hbm %s876_s0, %s416_s25 }
  0x2f   : > { %s148_s26 = scalar_lea.vmem [#allocation2], %s415_s24  ;;  %s145_s4 = scalar_lea.sflag [#allocation3], %s144_s21 }
  0x30   : > { %s155_s27 = sshll.u32 %s148_s26, 4  ;;  %p774_p12 = pnand %p463_p9, %p37_p13  ;;  %s778_s27 = int_to_ptr.vmem [resolvable:$true] %s155_s27 }
  0x31   : > { %s534_s5 = scalar_lea.hbm %s772_s22, 64  ;;  %s539_s8 = scalar_lea.hbm %s876_s0, 128 }
  0x32   : > { %p535_p0 = scmp.ne.s32.totalorder %s772_s22, %s534_s5  ;;  %p536_p3 = pneg %p774_p12 }
  0x33   : > { %p540_p11 = scmp.lt.u32.totalorder %s772_s22, %s876_s0  ;;  %p541_p1 = scmp.lt.u32.totalorder %s539_s8, %s534_s5 }
  0x34   : > { %p537_p5 = pnand %p536_p3, %p535_p0  ;;  %p543_p4 = scmp.lt.u32.totalorder %s534_s5, %s772_s22 }
  0x35   : > { %p542_p2 = por %p541_p1, %p540_p11 }
  0x36   : > { %p538_p7 = pneg %p537_p5 }
  0x37   : > { %p544_p6 = por %p543_p4, %p542_p2 }
  0x39   : > { %p545_p9 = pnand %p544_p6, %p538_p7 }
  0x3b   : > { %548 = shalt.err (!%p545_p9)
}
  0x3c   : > { %s549_s21 = scalar_lea.vmem %s778_s27, 64  ;;  %s637_s24 = smov [#allocation2]  }
  0x3d   : > { %p550_p10 = scmp.ne.s32.totalorder %s778_s27, %s549_s21  ;;  %s554_s25 = sshll.u32 %s637_s24, 4  ;;  %s555_s25 = int_to_ptr.vmem [resolvable:$false] %s554_s25 }
  0x3e   : > { %s556_s28 = scalar_lea.vmem %s555_s25, 128  ;;  %p557_p5 = scmp.lt.s32.totalorder %s778_s27, %s555_s25 }
  0x3f   : > { %p552_p13 = pnand %p550_p10, %p536_p3  ;;  %p558_p11 = scmp.lt.s32.totalorder %s556_s28, %s549_s21 }
  0x41   : > { %p553_p0 = pneg %p552_p13  ;;  %p559_p1 = por %p558_p11, %p557_p5 }
  0x43   : > { %p560_p2 = pnand %p559_p1, %p553_p0 }
  0x45   : > { %563 = shalt.err (!%p560_p2)
}
  0x46   : > { %457 = dma.hbm_to_vmem [thread:$0]  (!%p774_p12), %s772_s22, 64, %s778_s27, %s145_s4  }
  0x47   : > { %p894_p7 = scmp.ne.s32.totalorder %s885_s20, 0 }
  0x48   : > { %s808_s29 = sand.u32 (!%p894_p7), 1, %s626_s13   ;;  %p895_p3 = scmp.ne.s32.totalorder (!%p894_p7), %s883_s18, 0 }
  0x49   : > { %164 = sbr.rel (%p894_p7) target bundleno = 575 (0x23f), region = 28  ;;  %s418_s26 = sshll.u32 (!%p894_p7), %s808_s29, 2 }
  0x4a   : > { %s167_s5 = scalar_lea.sflag (!%p894_p7), [#allocation3], %s808_s29  ;;  %s170_s6 = scalar_lea.vmem (!%p894_p7), [#allocation2], %s418_s26 }
  0x50   : > { %609 = dma.done.wait (%p895_p3), %s167_s5, 64  }
  0x51   : > { %611 = vsyncadd (%p895_p3), %s167_s5, 4294967232  ;;  %p896_p4 = scmp.eq.s32.totalorder %s687_s16, 0 }
  0x53   : > { %613 = dma.done.wait (%p896_p4), [#allocation6], 128   ;;  %p897_p12 = pmov %p896_p4 }
  0x54   : > { %v638_v0 = vmov 0.0|0.0   ;;  %vm639_vm0 = vmmov 0   ;;  %v640_v1 = vmov 0.0   ;;  %v197_v2 = vld [vmem:[%s170_s6] sm:$0xf]  ;;  %s641_s20 = smov 1  }
  0x55   : > { %615 = vsyncadd (%p897_p12), [#allocation6], 4294967168  ;;  %438 = vmatprep.subr.bf16.mxu0 %v638_v0  ;;  %435 = vmatprep.mubr.msk.f32.mxu0 %vm639_vm0, %v640_v1  ;;  %s642_s22 = smov 127   ;;  %vm202_vm1 = vcmask 7168   ;;  %v209_v4 = vrot.slane %v197_v2, 4  ;;  %vm207_vm2 = vcmask 121856  }
  0x56   : > { %199 = vrot.lane.b32.xlu0 %v197_v2, %s641_s20  ;;  %vm211_vm3 = vcmask 1043456   ;;  %vm643_vm4 = vmmov 1   ;;  %v213_v10 = vld [vmem:[#allocation5] sm:$0xff]  ;;  %vm214_vm6 = vcmask 97280   ;;  %s420_s18 = sshll.u32 %s808_s29, 3  ;;  %vm291_vm7 = vcmask 130048  }
  0x57   : > { %vm440_vm5 = vmpackc.low %vm211_vm3, %vm643_vm4  ;;  %s194_s27 = scalar_lea.vmem [#allocation7], %s420_s18  ;;  %p898_p6 = scmp.ne.s32.totalorder %s687_s16, 0 }
  0x58   : > { %vm297_vm8 = vcmask (!%p898_p6), 15360   ;;  %v644_v13 = vmov (!%p898_p6), 0.0  }
  0x59   : > { %298 = vst.msk [vmem:[%s879_s3] sm:$0xff] (!%p898_p6), %vm297_vm8, %v644_v13 }
  0x5a   : > { %204 = vrot.lane.b32.xlu0 %v197_v2, %s642_s22 }
  0xc8   : > { %v200_v3 = vpop.permute.xlu0 %199 }
  0xc9   : > { %v203_v5 = vsel %vm202_vm1, 0.0, %v200_v3 }
  0xca   : > { %v212_v8 = vsel %vm211_vm3, %v203_v5, %v209_v4 }
  0xcc   : > { %v205_v6 = vpop.permute.xlu0 %204 }
  0xcd   : > { %v208_v7 = vsel %vm207_vm2, %v205_v6, 0.0 }
  0xce   : > { %v439_v9 = vpack.c.bf16 %v208_v7, %v212_v8 }
  0xd0   : > { %441 = vmatpush3.bf16.msk.msra.mxu0 %vm440_vm5, %v439_v9 }
  0xd3   : > { %436 = vmatmul.mubr.msk.f32.vlgmr.msra.gmra.mrb[0].mxu0 %vm214_vm6, %v213_v10 }
 0x1a1   : > { %296 = sbr.rel (%p898_p6) target bundleno = 424 (0x1a8), region = 40 }
 0x1a6   : > { %v287_v11 = vpop.f32.mrb[0].mxu0 }
 0x1a7   : > { %292 = vst.msk [vmem:[%s194_s27] sm:$0xff] %vm291_vm7, %v287_v11  ;;  %v437_v12 = vpop.f32.mrb[1].mxu0 }
 0x1a8 PF: > { %v300_v14 = vsel %vm291_vm7, %v287_v11, 0.0  ;;  %v303_v15 = vmul.f32 %v287_v11, %v287_v11  ;;  %s425_s7 = sshll.u32 %s687_s16, 7  ;;  %s325_s8 = sshll.u32 %s194_s27, 4  ;;  %s326_s8 = int_to_ptr.vmem [resolvable:$true] %s325_s8 }
 0x1a9   : > { %301 = vadd.xlane.f32.xlu0 %v300_v14  ;;  %s831_s21 = scalar_lea.hbm %s878_s2, %s425_s7  ;;  %s312_s24 = scalar_lea.sflag [#allocation4], %s808_s29 }
 0x1aa   : > { %v304_v16 = vsel %vm291_vm7, %v303_v15, 0.0  ;;  %s564_s25 = scalar_lea.vmem %s326_s8, 128  ;;  %s645_s28 = smov [#allocation7]  }
 0x1ab   : > { %p565_p9 = scmp.ne.s32.totalorder %s326_s8, %s564_s25  ;;  %s568_s26 = sshll.u32 %s645_s28, 4  ;;  %s569_s26 = int_to_ptr.vmem [resolvable:$false] %s568_s26 }
 0x1ac   : > { %s570_s5 = scalar_lea.vmem %s569_s26, 256  ;;  %p571_p0 = scmp.lt.s32.totalorder %s326_s8, %s569_s26 }
 0x1ad   : > { %305 = vadd.xlane.f32.xlu0 %v304_v16  ;;  %p566_p10 = pnand %p565_p9, %p759_p8  ;;  %p572_p5 = scmp.lt.s32.totalorder %s570_s5, %s564_s25 }
 0x1af   : > { %p567_p13 = pneg %p566_p10  ;;  %p573_p11 = por %p572_p5, %p571_p0 }
 0x1b1   : > { %p574_p1 = pnand %p573_p11, %p567_p13 }
 0x1b3   : > { %577 = shalt.err (!%p574_p1)
}
 0x1b4   : > { %s578_s16 = scalar_lea.hbm %s831_s21, 128  ;;  %s582_s20 = scalar_lea.hbm %s878_s2, 256 }
 0x1b5   : > { %p579_p2 = scmp.ne.s32.totalorder %s831_s21, %s578_s16  ;;  %p583_p4 = scmp.lt.u32.totalorder %s831_s21, %s878_s2 }
 0x1b6   : > { %p584_p12 = scmp.lt.u32.totalorder %s582_s20, %s578_s16  ;;  %p586_p9 = scmp.lt.u32.totalorder %s578_s16, %s831_s21 }
 0x1b7   : > { %p580_p7 = pnand %p579_p2, %p759_p8 }
 0x1b8   : > { %p585_p6 = por %p584_p12, %p583_p4 }
 0x1b9   : > { %p581_p3 = pneg %p580_p7 }
 0x1ba   : > { %p587_p10 = por %p586_p9, %p585_p6 }
 0x1bc   : > { %p588_p13 = pnand %p587_p10, %p581_p3 }
 0x1be   : > { %591 = shalt.err (!%p588_p13)
}
 0x1bf   : > { %448 = dma.vmem_to_hbm [thread:$0]  (%p759_p8), %s326_s8, 128, %s831_s21, %s312_s24   ;;  %v299_v18 = vld [vmem:[%s879_s3] sm:$0xff]  ;;  %vm309_vm9 = vcmask 15360  }
 0x236   : > { %v302_v17 = vpop.xlane.xlu0 %301 }
 0x23a   : > { %v306_v19 = vpop.xlane.xlu0 %305 }
 0x23b   : > { %v307_v20 = vsel %vm202_vm1, %v302_v17, %v306_v19 }
 0x23c   : > { %v308_v21 = vadd.f32 %v307_v20, %v299_v18 }
 0x23e   : > { %310 = vst.msk [vmem:[%s879_s3] sm:$0xff] %vm309_vm9, %v308_v21 }
 0x23f PF: > { %s343_s17 = sand.u32 1, %s622_s12   ;;  %p899_p8 = scmp.ne.s32.totalorder %s884_s19, 0 }
 0x240   : > { %p900_p0 = scmp.ge.s32.totalorder %s634_s15, 2  ;;  %s344_s8 = scalar_lea.sflag [#allocation4], %s343_s17 }
 0x242   : > { %p459_p5 = pnand %p900_p0, %p899_p8 }
 0x244   : > { %617 = dma.done.wait (!%p459_p5), %s344_s8, 128  }
 0x245   : > { %619 = vsyncadd (!%p459_p5), %s344_s8, 4294967168  ;;  %p18_p11 = scmp.ge.s32.totalorder %s715_s23, 4   ;;  %s901_s12 = smov %s626_s13 }
 0x246   : > { %s902_s13 = smov %s630_s14  ;;  %s903_s14 = smov %s751_s11 }
 0x247   : > { %s904_s15 = smov %s715_s23  ;;  %20 = sbr.rel (!%p18_p11) target bundleno = 6 (0x6), region = 89 }
 0x24e   :  { %349 = vsyncpa [#allocation3], 1 }
 0x24f   :  { %351 = vsyncpa [#allocation3 + $0x1], 1 }
 0x250   :  { %352 = vsyncpa [#allocation6], 1 }
 0x251   :  { %353 = vsyncpa [#allocation4], 1 }
 0x252   :  { %355 = vsyncpa [#allocation4 + $0x1], 1 }

</bundles_post_ra>
